<compile_context>
chip_gen: v7x
topology: tpu7x:2x2x1
jax: 0.10.0
libtpu: 0.0.40
codegen_flags: <defaults>
</compile_context>

<pallas_src>
import functools

import jax
import jax.numpy as jnp
from jax.experimental import pallas as pl
from jax.experimental.pallas import tpu as pltpu

_LANES = 128
_SUBLANES = 8
_PARTS = 2                     # leading parallel axis (megacore: one part per TC)


def _round_up(x, m):
    return -(-x // m) * m


def _cdiv(a, b):
    return -(-a // b)


@functools.lru_cache(maxsize=None)
def _vmem_capacity_bytes():
    """Defensive trace-time VMEM query; conservative fallback = 64 MiB (v7x)."""
    try:
        info = pltpu.get_tpu_info()
        cap = int(getattr(info, "vmem_capacity_bytes", 0))
        if cap > 0:
            return cap
    except Exception:
        pass
    return 64 * 1024 * 1024


def _select_config(for_none):
    """(max_tile_rows, vmem_limit_bytes) per path / generation."""
    if for_none:
        # 2 inputs x 2 bufs x 4 MiB + 2 x 4 MiB output bufs = 24 MiB
        return 8192, 32 * 1024 * 1024
    if _vmem_capacity_bytes() >= 100 * 1024 * 1024:   # v5e / v6e (128 MiB VMEM)
        # 2 inputs x 2 bufs x 8 MiB = 32 MiB of input buffers
        return 16384, 64 * 1024 * 1024
    # v7x (64 MiB physical VMEM): 2 x 2 x 4 MiB = 16 MiB
    return 8192, 32 * 1024 * 1024


def _plan(rows, parts, max_tile_rows):
    """Tile/grid plan over `rows` lane-dense rows; no padding to tile size."""
    tile_rows = min(max_tile_rows,
                    _round_up(max(_cdiv(rows, parts), 1), _SUBLANES))
    nblocks = max(_cdiv(rows, tile_rows), 1)       # blocks that contain data
    steps = _cdiv(nblocks, parts)
    return tile_rows, nblocks, steps


def _to_slab(x, rows):
    """Lane-dense (rows, 128) slab. Pads (zeros) only when n % 128 != 0."""
    flat = x.reshape(-1)
    pad = rows * _LANES - flat.shape[0]
    if pad:
        # zeros: log(0+1) - log(0+1) == 0, contributes nothing to the sum
        flat = jnp.pad(flat, (0, pad))
    return flat.reshape(rows, _LANES)


# -------------------- reduction kernel ('mean' / 'sum') --------------------

def _make_reduce_kernel(tile_rows, steps, total_rows, need_mask):
    def kernel(pred_ref, trg_ref, out_ref):
        # out_ref is this part's (8,128) f32 accumulator, VMEM-resident across
        # the inner ('arbitrary') grid axis.
        i = pl.program_id(1)

        @pl.when(i == 0)
        def _():
            out_ref[...] = jnp.zeros_like(out_ref)

        p = pred_ref[...].astype(jnp.float32)
        t = trg_ref[...].astype(jnp.float32)
        d = jnp.log(p + 1.0) - jnp.log(t + 1.0)
        d2 = d * d

        if need_mask:
            # Mask by the *intended* (unclamped) global row index so that both
            # the ragged tail of the last data block and any clamped duplicate
            # blocks contribute exactly 0 (select, so OOB garbage/NaN is safe).
            blk = pl.program_id(0) * steps + i
            row = (blk * tile_rows
                   + jax.lax.broadcasted_iota(jnp.int32, (tile_rows, _LANES), 0))
            d2 = jnp.where(row < total_rows, d2, 0.0)

        # Reduce only along the sublane-block axis (pure VPU adds); the single
        # tiny cross-lane reduce happens once in the wrapper.
        out_ref[...] += jnp.sum(d2.reshape(-1, _SUBLANES, _LANES), axis=0)

    return kernel


def _rmsle_reduce(pred, trg, reduction):
    n = pred.size
    out_dtype = jnp.promote_types(pred.dtype, trg.dtype)
    rows = max(_cdiv(n, _LANES), 1)
    max_tile_rows, vmem_limit = _select_config(for_none=False)
    tile_rows, nblocks, steps = _plan(rows, _PARTS, max_tile_rows)
    need_mask = (_PARTS * steps * tile_rows) != rows

    p2d = _to_slab(pred, rows)
    t2d = _to_slab(trg, rows)

    if not need_mask:
        in_map = lambda p, i: (p * steps + i, 0)
    else:
        last = nblocks - 1
        # Clamp so no DMA targets a fully out-of-bounds block; duplicates are
        # zeroed by the in-kernel row mask.
        in_map = lambda p, i: (jnp.minimum(p * steps + i, last), 0)

    cost = pl.CostEstimate(
        flops=5 * n,
        transcendentals=2 * n,
        bytes_accessed=int(n * (pred.dtype.itemsize + trg.dtype.itemsize)
                           + _PARTS * _SUBLANES * _LANES * 4),
    )

    partials = pl.pallas_call(
        _make_reduce_kernel(tile_rows, steps, rows, need_mask),
        out_shape=jax.ShapeDtypeStruct((_PARTS * _SUBLANES, _LANES), jnp.float32),
        grid_spec=pltpu.PrefetchScalarGridSpec(
            num_scalar_prefetch=0,
            grid=(_PARTS, steps),
            in_specs=[
                pl.BlockSpec((tile_rows, _LANES), in_map),
                pl.BlockSpec((tile_rows, _LANES), in_map),
            ],
            out_specs=pl.BlockSpec((_SUBLANES, _LANES), lambda p, i: (p, 0)),
        ),
        compiler_params=pltpu.CompilerParams(
            dimension_semantics=("parallel", "arbitrary"),
            vmem_limit_bytes=vmem_limit,
        ),
        cost_estimate=cost,
    )(p2d, t2d)

    total = jnp.sum(partials)                 # one tiny (16,128) reduce
    if reduction == "mean":
        total = total / jnp.float32(n)
    return jnp.sqrt(total).astype(out_dtype)


# -------------------- elementwise kernel ('none') --------------------

def _rmsle_none_kernel(pred_ref, trg_ref, out_ref):
    p = pred_ref[...].astype(jnp.float32)
    t = trg_ref[...].astype(jnp.float32)
    d = jnp.log(p + 1.0) - jnp.log(t + 1.0)
    out_ref[...] = jnp.abs(d).astype(out_ref.dtype)   # sqrt(d*d) == |d|


def _rmsle_none(pred, trg):
    n = pred.size
    out_dtype = jnp.promote_types(pred.dtype, trg.dtype)
    rows = max(_cdiv(n, _LANES), 1)
    max_tile_rows, vmem_limit = _select_config(for_none=True)
    tile_rows, nblocks, _ = _plan(rows, 1, max_tile_rows)

    p2d = _to_slab(pred, rows)
    t2d = _to_slab(trg, rows)

    cost = pl.CostEstimate(
        flops=4 * n,
        transcendentals=2 * n,
        bytes_accessed=int(n * (pred.dtype.itemsize + trg.dtype.itemsize
                                + jnp.dtype(out_dtype).itemsize)),
    )

    # Output is exactly (rows, 128): partial last blocks are fine — Pallas
    # discards out-of-bounds writes, so no over-allocation and (for aligned n)
    # no trailing slice copy.
    out2d = pl.pallas_call(
        _rmsle_none_kernel,
        out_shape=jax.ShapeDtypeStruct((rows, _LANES), out_dtype),
        grid_spec=pltpu.PrefetchScalarGridSpec(
            num_scalar_prefetch=0,
            grid=(nblocks,),
            in_specs=[
                pl.BlockSpec((tile_rows, _LANES), lambda i: (i, 0)),
                pl.BlockSpec((tile_rows, _LANES), lambda i: (i, 0)),
            ],
            out_specs=pl.BlockSpec((tile_rows, _LANES), lambda i: (i, 0)),
        ),
        compiler_params=pltpu.CompilerParams(
            dimension_semantics=("parallel",),
            vmem_limit_bytes=vmem_limit,
        ),
        cost_estimate=cost,
    )(p2d, t2d)

    flat = out2d.reshape(-1)
    if rows * _LANES != n:            # only when n % 128 != 0
        flat = flat[:n]
    return flat.reshape(pred.shape)


# -------------------- public wrapper (mirrors Loss5.forward) --------------------

def rmsle_loss(pred, trg, reduction="mean"):
    if reduction == "none":
        return _rmsle_none(pred, trg)
    elif reduction == "sum":
        return _rmsle_reduce(pred, trg, "sum")
    else:  # 'mean' (default)
        return _rmsle_reduce(pred, trg, "mean")


if __name__ == "__main__":
    key = jax.random.PRNGKey(0)
    k1, k2 = jax.random.split(key)
    # Small positive inputs (like predictions/targets for RMSLE), NCHW layout.
    pred = jax.random.uniform(k1, (2, 4, 16, 16), dtype=jnp.float32,
                              minval=0.0, maxval=5.0)
    trg = jax.random.uniform(k2, (2, 4, 16, 16), dtype=jnp.float32,
                             minval=0.0, maxval=5.0)

    out_mean = jax.block_until_ready(rmsle_loss(pred, trg, reduction="mean"))
    out_sum = jax.block_until_ready(rmsle_loss(pred, trg, reduction="sum"))
    out_none = jax.block_until_ready(rmsle_loss(pred, trg, reduction="none"))

    # Reference check in plain JAX.
    d = jnp.log(pred + 1.0) - jnp.log(trg + 1.0)
    ref_mean = jnp.sqrt(jnp.mean(d * d))
    ref_sum = jnp.sqrt(jnp.sum(d * d))
    ref_none = jnp.abs(d)

    assert jnp.allclose(out_mean, ref_mean, rtol=1e-5, atol=1e-6), (out_mean, ref_mean)
    assert jnp.allclose(out_sum, ref_sum, rtol=1e-5, atol=1e-6), (out_sum, ref_sum)
    assert out_none.shape == pred.shape and out_none.dtype == pred.dtype
    assert jnp.allclose(out_none, ref_none, rtol=1e-5, atol=1e-6)

    # Exercise an unaligned shape (ragged tail handled in-kernel by masking).
    k3, k4 = jax.random.split(k2)
    pred_u = jax.random.uniform(k3, (3, 5, 7), dtype=jnp.float32,
                                minval=0.0, maxval=5.0)
    trg_u = jax.random.uniform(k4, (3, 5, 7), dtype=jnp.float32,
                               minval=0.0, maxval=5.0)
    du = jnp.log(pred_u + 1.0) - jnp.log(trg_u + 1.0)
    assert jnp.allclose(rmsle_loss(pred_u, trg_u, "mean"),
                        jnp.sqrt(jnp.mean(du * du)), rtol=1e-5, atol=1e-6)
    assert jnp.allclose(rmsle_loss(pred_u, trg_u, "sum"),
                        jnp.sqrt(jnp.sum(du * du)), rtol=1e-5, atol=1e-6)
    assert jnp.allclose(rmsle_loss(pred_u, trg_u, "none"),
                        jnp.abs(du), rtol=1e-5, atol=1e-6)

    print("KERNEL_OK")
</pallas_src>

<mosaic_0001>
module attributes {stable_mosaic.version = 11 : i64} {
  func.func @kernel(%arg0: i32, %arg1: i32, %arg2: memref<8x128xf32, #tpu.memory_space<vmem>>, %arg3: memref<8x128xf32, #tpu.memory_space<vmem>>, %arg4: memref<8x128xf32, #tpu.memory_space<vmem>>) attributes {dimension_semantics = [#tpu.dimension_semantics<parallel>, #tpu.dimension_semantics<arbitrary>], iteration_bounds = array<i64: 2, 1>, scalar_prefetch = 0 : i64, scratch_operands = 0 : i64, tpu.core_type = #tpu.core_type<tc>, window_params = [{transform_indices = @transform_0, window_bounds = array<i64: 8, 128>}, {transform_indices = @transform_1, window_bounds = array<i64: 8, 128>}, {transform_indices = @transform_2, window_bounds = array<i64: 8, 128>}]} {
    %c0_i32 = arith.constant 0 : i32
    %0 = arith.cmpi eq, %arg1, %c0_i32 : i32
    %1 = arith.extui %0 : i1 to i32
    %c0_i32_0 = arith.constant 0 : i32
    %2 = arith.cmpi ne, %1, %c0_i32_0 : i32
    scf.if %2 {
      %cst_10 = arith.constant 0.000000e+00 : f32
      %18 = vector.broadcast %cst_10 : f32 to vector<8x128xf32>
      %c0_11 = arith.constant 0 : index
      %c0_12 = arith.constant 0 : index
      %19 = vector.load %arg4[%c0_11, %c0_12] : memref<8x128xf32, #tpu.memory_space<vmem>>, vector<8x128xf32>
      tpu.vector_store %arg4[%c0_11, %c0_12], %18 {strides = array<i32>} : memref<8x128xf32, #tpu.memory_space<vmem>>, vector<8x128xf32>,
    } else {
    }
    %c0 = arith.constant 0 : index
    %c0_1 = arith.constant 0 : index
    %3 = vector.load %arg2[%c0, %c0_1] : memref<8x128xf32, #tpu.memory_space<vmem>>, vector<8x128xf32>
    %c0_2 = arith.constant 0 : index
    %c0_3 = arith.constant 0 : index
    %4 = vector.load %arg3[%c0_2, %c0_3] : memref<8x128xf32, #tpu.memory_space<vmem>>, vector<8x128xf32>
    %cst = arith.constant 1.000000e+00 : f32
    %5 = vector.broadcast %cst : f32 to vector<8x128xf32>
    %6 = arith.addf %3, %5 : vector<8x128xf32>
    %7 = math.log %6 : vector<8x128xf32>
    %cst_4 = arith.constant 1.000000e+00 : f32
    %8 = vector.broadcast %cst_4 : f32 to vector<8x128xf32>
    %9 = arith.addf %4, %8 : vector<8x128xf32>
    %10 = math.log %9 : vector<8x128xf32>
    %11 = arith.subf %7, %10 : vector<8x128xf32>
    %12 = arith.mulf %11, %11 : vector<8x128xf32>
    %c0_5 = arith.constant 0 : index
    %c0_6 = arith.constant 0 : index
    %13 = vector.load %arg4[%c0_5, %c0_6] : memref<8x128xf32, #tpu.memory_space<vmem>>, vector<8x128xf32>
    %14 = vector.shape_cast %12 : vector<8x128xf32> to vector<1x8x128xf32>
    %cst_7 = arith.constant dense<0.000000e+00> : vector<8x128xf32>
    %15 = vector.multi_reduction <add>, %14, %cst_7 [0] : vector<1x8x128xf32> to vector<8x128xf32>
    %16 = arith.addf %13, %15 : vector<8x128xf32>
    %c0_8 = arith.constant 0 : index
    %c0_9 = arith.constant 0 : index
    %17 = vector.load %arg4[%c0_8, %c0_9] : memref<8x128xf32, #tpu.memory_space<vmem>>, vector<8x128xf32>
    tpu.vector_store %arg4[%c0_8, %c0_9], %16 {strides = array<i32>} : memref<8x128xf32, #tpu.memory_space<vmem>>, vector<8x128xf32>,
    return
  }
  func.func @transform_0(%arg0: i32, %arg1: i32) -> (i32, i32) {
    %c1_i32 = arith.constant 1 : i32
    %0 = arith.muli %arg0, %c1_i32 : i32
    %1 = arith.addi %0, %arg1 : i32
    %c0_i32 = arith.constant 0 : i32
    %c0_i32_0 = arith.constant 0 : i32
    return %1, %c0_i32 : i32, i32
  }
  func.func @transform_1(%arg0: i32, %arg1: i32) -> (i32, i32) {
    %c1_i32 = arith.constant 1 : i32
    %0 = arith.muli %arg0, %c1_i32 : i32
    %1 = arith.addi %0, %arg1 : i32
    %c0_i32 = arith.constant 0 : i32
    %c0_i32_0 = arith.constant 0 : i32
    return %1, %c0_i32 : i32, i32
  }
  func.func @transform_2(%arg0: i32, %arg1: i32) -> (i32, i32) {
    %c0_i32 = arith.constant 0 : i32
    %c0_i32_0 = arith.constant 0 : i32
    return %arg0, %c0_i32 : i32, i32
  }
}

</mosaic_0001>

<bundles_post_ra>
// kernel: tpu_custom_call.1
= control target key start
LH: loop header
LB: loop body
LE: loop exit
PB: predicated region body
PF: predicated region fallthrough
CT: control target
= control target key end

     0   :  { %7 = vsyncpa [#allocation3], 0  ;;  %s826_s0 = inlined_call_operand.hbm [shape: f32[16,128], index: 0, kind: input, shape index: {}]   ;;  %s827_s1 = inlined_call_operand.hbm [shape: f32[16,128], index: 1, kind: input, shape index: {}]   ;;  %s828_s2 = inlined_call_operand.hbm [shape: f32[16,128], index: 2, kind: output, shape index: {}]  }
   0x1   :  { %9 = vsyncpa [#allocation3 + $0x1], 0 }
   0x2   :  { %10 = vsyncpa [#allocation6], 0 }
   0x3   :  { %12 = vsyncpa [#allocation6 + $0x1], 0 }
   0x4   :  { %13 = vsyncpa [#allocation4], 0 }
   0x5   :  { %15 = vsyncpa [#allocation4 + $0x1], 0  ;;  %s606_s9 = smov 0   ;;  %s608_s10 = smov 0  }
   0x6   :  { %s610_s11 = smov 0   ;;  %s612_s12 = smov 0  }
   0x7   :  { %s614_s13 = smov 0   ;;  %s616_s14 = smov 0  }
   0x8 LB: > { %s352_s15 = sadd.s32 4294967295, %s586_s14   ;;  %s353_s16 = sadd.s32 4294967294, %s586_s14   ;;  %s586_s14 = sphi %s616_s14, %s21_s14   ;;  %s582_s13 = sphi %s614_s13, %s848_s13   ;;  %s578_s12 = sphi %s612_s12, %s847_s12   ;;  %s574_s11 = sphi %s610_s11, %s846_s11   ;;  %s570_s10 = sphi %s608_s10, %s845_s10   ;;  %s566_s9 = sphi %s606_s9, %s844_s9  }
   0x9   : > { %s33_s17 = sadd.s32 1, %s582_s13  ;;  %s42_s18 = sadd.s32 1, %s574_s11 }
   0xa   : > { %p35_p0 = scmp.ge.s32.totalorder %s33_s17, 2  ;;  %p49_p1 = scmp.ne.s32.totalorder %s574_s11, %s570_s10 }
   0xb   : > { %p50_p2 = scmp.eq.s32.totalorder %s586_s14, 0  ;;  %p55_p3 = scmp.ne.s32.totalorder %s570_s10, %s566_s9 }
   0xc   : > { %s850_s17 = smov (%p35_p0, %s33_s17), 0  ;;  %p56_p5 = scmp.eq.s32.totalorder %s352_s15, 0 }
   0xd   : > { %p647_p4 = por %p50_p2, %p49_p1  ;;  %s39_s20 = ssub.s32 %s582_s13, %s850_s17 }
   0xe   : > { %p107_p6 = scmp.eq.s32.totalorder %s352_s15, 1  ;;  %p40_p7 = scmp.eq.s32.totalorder %s39_s20, 0 }
   0xf   : > { %p653_p8 = por %p56_p5, %p55_p3  ;;  %p113_p10 = scmp.eq.s32.totalorder %s353_s16, 1 }
  0x10   : > { %p657_p9 = por %p107_p6, %p49_p1  ;;  %p385_p13 = scmp.lt.s32.totalorder %s586_s14, 2 }
  0x11   : > { %s832_s21 = scalar_select %p653_p8, 1, 0 }
  0x12   : > { %s833_s22 = scalar_select %p657_p9, 1, 0 }
  0x13   : > { %s662_s23 = scalar_select %p40_p7, %s574_s11, %s42_s18  }
  0x14   : > { %p664_p11 = por %p113_p10, %p55_p3  ;;  %s671_s25 = sand.u32 1, %s574_s11  }
  0x15   : > { %s356_s26 = sshll.u32 %s671_s25, 3  ;;  %s357_s27 = sshll.u32 %s582_s13, 7 }
  0x16   : > { %s834_s24 = scalar_select %p664_p11, 1, 0 }
  0x17   : > { %s680_s30 = scalar_lea.hbm %s826_s0, %s357_s27  ;;  %s137_s3 = scalar_lea.vmem [#allocation2], %s356_s26 }
  0x18   : > { %s145_s4 = sshll.u32 %s137_s3, 4  ;;  %p688_p0 = pnand %p385_p13, %p647_p4  ;;  %s684_s4 = int_to_ptr.vmem [resolvable:$true] %s145_s4 }
  0x19   : > { %s134_s6 = scalar_lea.sflag [#allocation3], %s671_s25  ;;  %s440_s7 = scalar_lea.hbm %s680_s30, 128 }
  0x1a   : > { %p441_p3 = scmp.ne.s32.totalorder %s680_s30, %s440_s7  ;;  %p442_p5 = pneg %p688_p0 }
  0x1b   : > { %s445_s16 = scalar_lea.hbm %s826_s0, 256  ;;  %p446_p4 = scmp.lt.u32.totalorder %s680_s30, %s826_s0 }
  0x1c   : > { %p443_p6 = pnand %p442_p5, %p441_p3  ;;  %p447_p10 = scmp.lt.u32.totalorder %s445_s16, %s440_s7 }
  0x1d   : > { %p449_p12 = scmp.lt.u32.totalorder %s440_s7, %s680_s30 }
  0x1e   : > { %p444_p7 = pneg %p443_p6  ;;  %p448_p13 = por %p447_p10, %p446_p4 }
  0x20   : > { %p450_p1 = por %p449_p12, %p448_p13 }
  0x22   : > { %p451_p2 = pnand %p450_p1, %p444_p7 }
  0x24   : > { %454 = shalt.err (!%p451_p2)
}
  0x25   : > { %s455_s20 = scalar_lea.vmem %s684_s4, 128  ;;  %s588_s28 = smov [#allocation2]  }
  0x26   : > { %p456_p3 = scmp.ne.s32.totalorder %s684_s4, %s455_s20  ;;  %s460_s29 = sshll.u32 %s588_s28, 4  ;;  %s461_s29 = int_to_ptr.vmem [resolvable:$false] %s460_s29 }
  0x27   : > { %s462_s3 = scalar_lea.vmem %s461_s29, 256  ;;  %p463_p9 = scmp.lt.s32.totalorder %s684_s4, %s461_s29 }
  0x28   : > { %p458_p6 = pnand %p456_p3, %p442_p5  ;;  %p464_p4 = scmp.lt.s32.totalorder %s462_s3, %s455_s20 }
  0x2a   : > { %p459_p11 = pneg %p458_p6  ;;  %p465_p10 = por %p464_p4, %p463_p9 }
  0x2c   : > { %p466_p12 = pnand %p465_p10, %p459_p11 }
  0x2e   : > { %469 = shalt.err (!%p466_p12)
}
  0x2f   : > { %377 = dma.hbm_to_vmem [thread:$0]  (!%p688_p0), %s680_s30, 128, %s684_s4, %s134_s6  }
  0x30   : > { %p836_p1 = scmp.lt.s32.totalorder %s586_s14, 3  ;;  %p837_p2 = scmp.ge.s32.totalorder %s586_s14, 1 }
  0x31   : > { %s733_s16 = scalar_lea.hbm %s827_s1, %s357_s27  ;;  %s156_s18 = scalar_lea.vmem [#allocation5], %s356_s26 }
  0x32   : > { %p724_p7 = pnand %p837_p2, %p836_p1  ;;  %s164_s19 = sshll.u32 %s156_s18, 4  ;;  %s165_s19 = int_to_ptr.vmem [resolvable:$true] %s164_s19 }
  0x33   : > { %s153_s30 = scalar_lea.sflag [#allocation6], %s671_s25  ;;  %s470_s4 = scalar_lea.hbm %s733_s16, 128 }
  0x34   : > { %s838_s7 = scalar_select %p724_p7, 1, 0 }
  0x35   : > { %p471_p9 = scmp.ne.s32.totalorder %s733_s16, %s470_s4  ;;  %s475_s27 = scalar_lea.hbm %s827_s1, 256 }
  0x36   : > { %p476_p3 = scmp.lt.u32.totalorder %s733_s16, %s827_s1  ;;  %p477_p6 = scmp.lt.u32.totalorder %s475_s27, %s470_s4 }
  0x37   : > { %p473_p11 = pnand %p471_p9, %p442_p5  ;;  %p479_p10 = scmp.lt.u32.totalorder %s470_s4, %s733_s16 }
  0x38   : > { %p478_p4 = por %p477_p6, %p476_p3 }
  0x39   : > { %p474_p13 = pneg %p473_p11 }
  0x3a   : > { %p480_p12 = por %p479_p10, %p478_p4 }
  0x3c   : > { %p481_p1 = pnand %p480_p12, %p474_p13 }
  0x3e   : > { %484 = shalt.err (!%p481_p1)
}
  0x3f   : > { %s485_s25 = scalar_lea.vmem %s165_s19, 128  ;;  %s589_s26 = smov [#allocation5]  }
  0x40   : > { %p486_p2 = scmp.ne.s32.totalorder %s165_s19, %s485_s25  ;;  %s490_s3 = sshll.u32 %s589_s26, 4  ;;  %s491_s3 = int_to_ptr.vmem [resolvable:$false] %s490_s3 }
  0x41   : > { %s492_s8 = scalar_lea.vmem %s491_s3, 256  ;;  %p493_p8 = scmp.lt.s32.totalorder %s165_s19, %s491_s3 }
  0x42   : > { %p488_p9 = pnand %p486_p2, %p442_p5  ;;  %p494_p7 = scmp.lt.s32.totalorder %s492_s8, %s485_s25 }
  0x44   : > { %p489_p11 = pneg %p488_p9  ;;  %p495_p3 = por %p494_p7, %p493_p8 }
  0x46   : > { %p496_p6 = pnand %p495_p3, %p489_p11 }
  0x48   : > { %499 = shalt.err (!%p496_p6)
}
  0x49   : > { %380 = dma.hbm_to_vmem [thread:$0]  (!%p688_p0), %s733_s16, 128, %s165_s19, %s153_s30  }
  0x4a   : > { %p839_p13 = scmp.ne.s32.totalorder %s838_s7, 0 }
  0x4b   : > { %s760_s15 = sand.u32 (!%p839_p13), 1, %s570_s10   ;;  %p840_p5 = scmp.ne.s32.totalorder (!%p839_p13), %s832_s21, 0 }
  0x4c   : > { %173 = sbr.rel (%p839_p13) target bundleno = 121 (0x79), region = 28  ;;  %s361_s18 = sshll.u32 (!%p839_p13), %s760_s15, 3 }
  0x4d   : > { %s176_s4 = scalar_lea.sflag (!%p839_p13), [#allocation3], %s760_s15  ;;  %s179_s6 = scalar_lea.vmem (!%p839_p13), [#allocation2], %s361_s18 }
  0x53   : > { %553 = dma.done.wait (%p840_p5), %s176_s4, 128  }
  0x54   : > { %555 = vsyncadd (%p840_p5), %s176_s4, 4294967168  ;;  %s185_s5 = scalar_lea.sflag [#allocation6], %s760_s15  ;;  %s188_s16 = scalar_lea.vmem [#allocation5], %s361_s18 }
  0x55   : > { %557 = dma.done.wait (%p840_p5), %s185_s5, 128  }
  0x56   : > { %559 = vsyncadd (%p840_p5), %s185_s5, 4294967168  ;;  %v221_v0 = vld [vmem:[%s179_s6] sm:$0xff]  ;;  %v222_v1 = vld [vmem:[%s188_s16] sm:$0xff]  ;;  %s365_s7 = sshll.u32 %s578_s12, 7  ;;  %s213_s19 = scalar_lea.vmem [#allocation7], %s361_s18 }
  0x57   : > { %v223_v2 = vadd.f32 1.0, %v221_v0  ;;  %v226_v3 = vadd.f32 1.0, %v222_v1  ;;  %s249_s30 = sshll.u32 %s213_s19, 4  ;;  %s777_s27 = scalar_lea.hbm %s828_s2, %s365_s7  ;;  %s779_s30 = int_to_ptr.vmem [resolvable:$true] %s249_s30 }
  0x58   : > { %s236_s28 = scalar_lea.sflag [#allocation4], %s760_s15  ;;  %s500_s29 = scalar_lea.vmem %s779_s30, 128 }
  0x59   : > { %436 = vlog2.f32 %v223_v2  ;;  %p501_p8 = scmp.ne.s32.totalorder %s779_s30, %s500_s29  ;;  %p841_p0 = scmp.ne.s32.totalorder %s833_s22, 0 }
  0x5a   : > { %438 = vlog2.f32 %v226_v3  ;;  %s590_s12 = smov [#allocation7]  }
  0x5b   : > { %p502_p7 = pnand %p501_p8, %p841_p0  ;;  %s504_s25 = sshll.u32 %s590_s12, 4  ;;  %s505_s25 = int_to_ptr.vmem [resolvable:$false] %s504_s25 }
  0x5c   : > { %s506_s26 = scalar_lea.vmem %s505_s25, 256  ;;  %p507_p10 = scmp.lt.s32.totalorder %s779_s30, %s505_s25 }
  0x5d   : > { %p503_p4 = pneg %p502_p7  ;;  %p508_p12 = scmp.lt.s32.totalorder %s506_s26, %s500_s29 }
  0x5f   : > { %p509_p1 = por %p508_p12, %p507_p10 }
  0x61   : > { %p510_p2 = pnand %p509_p1, %p503_p4 }
  0x63   : > { %v437_v4 = vpop.eup %436 }
  0x64   : > { %v439_v5 = vpop.eup %438  ;;  %v225_v6 = vmul.f32 0.6931472, %v437_v4 }
  0x65   : > { %v228_v7 = vmul.f32 0.6931472, %v439_v5 }
  0x67   : > { %v229_v8 = vsub.f32 %v225_v6, %v228_v7 }
  0x69   : > { %v230_v9 = vmul.f32 %v229_v8, %v229_v8 }
  0x6b   : > { %234 = vst [vmem:[%s213_s19] sm:$0xff] %v230_v9 }
  0x6c   : > { %513 = shalt.err (!%p510_p2)
}
  0x6d   : > { %s514_s3 = scalar_lea.hbm %s777_s27, 128  ;;  %s518_s18 = scalar_lea.hbm %s828_s2, 256 }
  0x6e   : > { %p515_p9 = scmp.ne.s32.totalorder %s777_s27, %s514_s3  ;;  %p519_p6 = scmp.lt.u32.totalorder %s777_s27, %s828_s2 }
  0x6f   : > { %p520_p13 = scmp.lt.u32.totalorder %s518_s18, %s514_s3  ;;  %p522_p8 = scmp.lt.u32.totalorder %s514_s3, %s777_s27 }
  0x70   : > { %p516_p11 = pnand %p515_p9, %p841_p0 }
  0x71   : > { %p521_p5 = por %p520_p13, %p519_p6 }
  0x72   : > { %p517_p3 = pneg %p516_p11 }
  0x73   : > { %p523_p7 = por %p522_p8, %p521_p5 }
  0x75   : > { %p524_p4 = pnand %p523_p7, %p517_p3 }
  0x77   : > { %527 = shalt.err (!%p524_p4)
}
  0x78   : > { %372 = dma.vmem_to_hbm [thread:$0]  (%p841_p0), %s779_s30, 128, %s777_s27, %s236_s28  }
  0x79 PF: > { %s261_s5 = sand.u32 1, %s566_s9   ;;  %p842_p10 = scmp.ne.s32.totalorder %s834_s24, 0 }
  0x7a   : > { %p843_p12 = scmp.ge.s32.totalorder %s586_s14, 2  ;;  %s262_s16 = scalar_lea.sflag [#allocation4], %s261_s5 }
  0x7c   : > { %p382_p1 = pnand %p843_p12, %p842_p10 }
  0x7e   : > { %561 = dma.done.wait (!%p382_p1), %s262_s16, 128  }
  0x7f   : > { %563 = vsyncadd (!%p382_p1), %s262_s16, 4294967168  ;;  %s21_s14 = sadd.s32 1, %s586_s14   ;;  %s844_s9 = smov %s570_s10 }
  0x80   : > { %p18_p2 = scmp.ge.s32.totalorder %s21_s14, 4   ;;  %s845_s10 = smov %s574_s11 }
  0x81   : > { %s846_s11 = smov %s662_s23  ;;  %s847_s12 = smov %s582_s13 }
  0x82   : > { %s848_s13 = smov %s850_s17  ;;  %20 = sbr.rel (!%p18_p2) target bundleno = 8 (0x8), region = 90 }
  0x89   :  { %267 = vsyncpa [#allocation3], 1 }
  0x8a   :  { %269 = vsyncpa [#allocation3 + $0x1], 1 }
  0x8b   :  { %270 = vsyncpa [#allocation6], 1 }
  0x8c   :  { %272 = vsyncpa [#allocation6 + $0x1], 1 }
  0x8d   :  { %273 = vsyncpa [#allocation4], 1 }
  0x8e   :  { %275 = vsyncpa [#allocation4 + $0x1], 1 }

</bundles_post_ra>
